<compile_context>
chip_gen: v7x
topology: tpu7x:2x2x1
jax: 0.10.0
libtpu: 0.0.40
codegen_flags: <defaults>
</compile_context>

<pallas_src>
import jax
import jax.numpy as jnp
from jax.experimental import pallas as pl
from jax.experimental.pallas import tpu as pltpu


def _ln_feat(x, g, b, eps=1e-5):
    """torch.nn.LayerNorm semantics over the feature axis (axis 0) of an (F, T) slab."""
    mu = jnp.mean(x, axis=0, keepdims=True)
    var = jnp.mean(jnp.square(x - mu), axis=0, keepdims=True)
    return (x - mu) * jax.lax.rsqrt(var + eps) * g + b


def make_grouping_kernel(f_in, f_out, win, iterations, temp):
    kf = win * f_out            # rows of stacked K (and of stacked V)

    def kernel(p_ref, wc_ref, wkv_ref, wq_ref, wm_ref, pcol_ref, o_ref):
        p = p_ref[...]                                   # (win*f_in, TM)
        f = f_out

        def col(i):                                      # i-th f_out-sized column param
            return pcol_ref[i * f:(i + 1) * f, :]        # (f_out, 1)

        conv_b, q_b, mlp_b = col(0), col(1), col(2)
        ln_conv_g, ln_conv_b = col(3), col(4)
        ln_v_g, ln_v_b = col(5), col(6)
        ln_mlp_g, ln_mlp_b = col(7), col(8)
        kv_b = pcol_ref[9 * f:9 * f + 2 * kf, :]         # (2*win*f_out, 1)

        # --- conv (stride == kernel_size => per-patch matmul), feature-major ---
        conv = jnp.dot(wc_ref[...], p, preferred_element_type=jnp.float32) + conv_b
        x = _ln_feat(conv, ln_conv_g, ln_conv_b)         # (f_out, TM)

        # --- K/V projections for all window positions fused into one matmul ---
        kv = jnp.dot(wkv_ref[...], p, preferred_element_type=jnp.float32) + kv_b
        k3 = kv[0:kf, :].reshape(win, f_out, -1)         # (win, f_out, TM)
        v3 = kv[kf:2 * kf, :].reshape(win, f_out, -1)    # (win, f_out, TM)

        # --- grouping iterations ---
        for _ in range(iterations):
            q = jnp.dot(wq_ref[...], x, preferred_element_type=jnp.float32) + q_b
            # attention logits over the win window positions, all at once: (win, TM)
            logits = temp * jnp.sum(k3 * q[None, :, :], axis=1)
            m = jnp.max(logits, axis=0, keepdims=True)                 # (1, TM)
            e = jnp.exp(logits - m)                                    # (win, TM)
            denom = jnp.sum(e, axis=0, keepdims=True)                  # (1, TM)
            # exact reciprocal (approx=True is ~bf16-accurate; too risky for 2e-3 tol)
            att = e * pl.reciprocal(denom, approx=False)               # (win, TM)
            update = jnp.sum(att[:, None, :] * v3, axis=0)             # (f_out, TM)
            x = x + _ln_feat(update, ln_v_g, ln_v_b)
            mlp = jnp.dot(wm_ref[...], x, preferred_element_type=jnp.float32) + mlp_b
            x = x + _ln_feat(mlp, ln_mlp_g, ln_mlp_b)

        o_ref[...] = x                                   # lane-dense (f_out, TM) store

    return kernel


def grouping_layer_pallas(x_nchw, params, kernel_size=2, iterations=3, temp=1.0):
    ks = kernel_size
    B, f_in, H, W = x_nchw.shape
    f_out = params['conv_w'].shape[0]
    win = ks * ks
    # The PyTorch module's .view(B, f_out, WIN, T) requires f_out == f_in*hidden_factor.
    assert params['k_w'].shape[0] == f_out, "module requires f_out == f_in * hidden_factor"
    Ho, Wo = H // ks, W // ks
    N = B * Ho * Wo

    # ---- glue: feature-major patch extraction + weight re-layout (plain JAX) ----
    # TODO(synk): for large H,W fuse the patch transpose into the kernel (band BlockSpec
    # over row strips) to avoid this wrapper-side HBM round trip; negligible at these sizes.
    x6 = x_nchw.reshape(B, f_in, Ho, ks, Wo, ks)
    patches_t = x6.transpose(3, 5, 1, 0, 2, 4).reshape(win * f_in, N)  # rows: (kh, kw, c)

    # conv weight (f_out, f_in, kh, kw) -> (f_out, win*f_in) with cols ordered (kh, kw, c)
    wc_t = jnp.transpose(params['conv_w'], (0, 2, 3, 1)).reshape(f_out, win * f_in)
    # fused block-diagonal K/V weight: (2*win*f_out, win*f_in)
    eye = jnp.eye(win, dtype=jnp.float32)
    wkv_t = jnp.concatenate([jnp.kron(eye, params['k_w']),
                             jnp.kron(eye, params['v_w'])], axis=0)
    wq_t = params['q_w']       # (f_out, f_out) — already feature-major
    wm_t = params['mlp_w']     # (f_out, f_out)

    kv_b = jnp.concatenate([jnp.tile(params['k_b'], win),
                            jnp.tile(params['v_b'], win)], axis=0)
    pcol = jnp.concatenate([params['conv_b'], params['q_b'], params['mlp_b'],
                            params['ln_conv_g'], params['ln_conv_b'],
                            params['ln_v_g'], params['ln_v_b'],
                            params['ln_mlp_g'], params['ln_mlp_b'],
                            kv_b], axis=0)[:, None]      # (9*f_out + 2*win*f_out, 1)

    # Column tile: large to amortize per-grid-step overhead; capped for tiny N.
    TM = 512
    n128 = pl.cdiv(N, 128) * 128
    if n128 < TM:
        TM = n128
    Npad = pl.cdiv(N, TM) * TM
    if Npad != N:
        patches_t = jnp.pad(patches_t, ((0, 0), (0, Npad - N)))

    kernel = make_grouping_kernel(f_in, f_out, win, iterations, float(temp))
    out = pl.pallas_call(
        kernel,
        out_shape=jax.ShapeDtypeStruct((f_out, Npad), jnp.float32),
        grid=(Npad // TM,),
        in_specs=[
            pl.BlockSpec((win * f_in, TM), lambda i: (0, i)),          # patches (col-tiled)
            pl.BlockSpec((f_out, win * f_in), lambda i: (0, 0)),       # conv weight
            pl.BlockSpec((2 * win * f_out, win * f_in), lambda i: (0, 0)),  # fused K/V weight
            pl.BlockSpec((f_out, f_out), lambda i: (0, 0)),            # q weight
            pl.BlockSpec((f_out, f_out), lambda i: (0, 0)),            # mlp weight
            pl.BlockSpec((pcol.shape[0], 1), lambda i: (0, 0)),        # biases + LN params
        ],
        out_specs=pl.BlockSpec((f_out, TM), lambda i: (0, i)),
        compiler_params=pltpu.CompilerParams(dimension_semantics=("parallel",)),
    )(patches_t, wc_t, wkv_t, wq_t, wm_t, pcol)

    out = out[:, :N].reshape(f_out, B, Ho, Wo)
    return jnp.transpose(out, (1, 0, 2, 3))              # NCHW, like PyTorch


# ---------------- pure-JAX reference (mirrors the torch code path) ----------------
def reference_forward(x_nchw, params, ks, iterations, temp):
    HI = jax.lax.Precision.HIGHEST
    B, f_in, H, W = x_nchw.shape
    f_out = params['conv_w'].shape[0]
    Ho, Wo = H // ks, W // ks
    win = ks * ks
    T = Ho * Wo

    def ln_c(x, g, b, eps=1e-5):  # LayerNorm over channel dim (dim 1) of NCHW
        xc = jnp.moveaxis(x, 1, -1)
        mu = xc.mean(-1, keepdims=True)
        var = ((xc - mu) ** 2).mean(-1, keepdims=True)
        y = (xc - mu) / jnp.sqrt(var + eps) * g + b
        return jnp.moveaxis(y, -1, 1)

    def linear_c(x, w, b):  # torch Linear applied over channel dim of NCHW
        return jnp.einsum('bchw,oc->bohw', x, w, precision=HI) + b[None, :, None, None]

    def unfold(x):  # F.unfold(kernel=ks, stride=ks), reshaped to (B, C, win, T)
        Bc, C = x.shape[:2]
        return (x.reshape(Bc, C, Ho, ks, Wo, ks)
                 .transpose(0, 1, 3, 5, 2, 4).reshape(Bc, C, win, T))

    conv = jax.lax.conv_general_dilated(
        x_nchw, params['conv_w'], (ks, ks), 'VALID',
        dimension_numbers=('NCHW', 'OIHW', 'NCHW'),
        precision=HI) + params['conv_b'][None, :, None, None]
    x_out = ln_c(conv, params['ln_conv_g'], params['ln_conv_b'])

    k = linear_c(x_nchw, params['k_w'], params['k_b'])
    v = linear_c(x_nchw, params['v_w'], params['v_b'])
    k_wins = unfold(k)
    v_wins = unfold(v)
    for _ in range(iterations):
        q = linear_c(x_out, params['q_w'], params['q_b']).reshape(B, f_out, T)
        att = jnp.einsum('bfwt,bft->bwt', k_wins, q, precision=HI)
        att = jax.nn.softmax(att * temp, axis=1)
        update = jnp.einsum('bfwt,bwt->bft', v_wins, att,
                            precision=HI).reshape(B, f_out, Ho, Wo)
        x_out = x_out + ln_c(update, params['ln_v_g'], params['ln_v_b'])
        x_out = x_out + ln_c(linear_c(x_out, params['mlp_w'], params['mlp_b']),
                             params['ln_mlp_g'], params['ln_mlp_b'])
    return x_out


if __name__ == "__main__":
    B, f_in, H, W = 2, 4, 16, 16
    hidden_factor = 2
    f_out = f_in * hidden_factor        # required by the module's view() semantics
    ks, iterations, temp = 2, 3, 1.0

    key = jax.random.PRNGKey(0)
    keys = jax.random.split(key, 17)
    params = {
        'conv_w':   0.1 * jax.random.normal(keys[0], (f_out, f_in, ks, ks), jnp.float32),
        'conv_b':   0.1 * jax.random.normal(keys[1], (f_out,), jnp.float32),
        'k_w':      0.1 * jax.random.normal(keys[2], (f_in * hidden_factor, f_in), jnp.float32),
        'k_b':      0.1 * jax.random.normal(keys[3], (f_in * hidden_factor,), jnp.float32),
        'q_w':      0.1 * jax.random.normal(keys[4], (f_in * hidden_factor, f_out), jnp.float32),
        'q_b':      0.1 * jax.random.normal(keys[5], (f_in * hidden_factor,), jnp.float32),
        'v_w':      0.1 * jax.random.normal(keys[6], (f_out, f_in), jnp.float32),
        'v_b':      0.1 * jax.random.normal(keys[7], (f_out,), jnp.float32),
        'mlp_w':    0.1 * jax.random.normal(keys[8], (f_out, f_out), jnp.float32),
        'mlp_b':    0.1 * jax.random.normal(keys[9], (f_out,), jnp.float32),
        'ln_conv_g': 1.0 + 0.1 * jax.random.normal(keys[10], (f_out,), jnp.float32),
        'ln_conv_b': 0.1 * jax.random.normal(keys[11], (f_out,), jnp.float32),
        'ln_v_g':    1.0 + 0.1 * jax.random.normal(keys[12], (f_out,), jnp.float32),
        'ln_v_b':    0.1 * jax.random.normal(keys[13], (f_out,), jnp.float32),
        'ln_mlp_g':  1.0 + 0.1 * jax.random.normal(keys[14], (f_out,), jnp.float32),
        'ln_mlp_b':  0.1 * jax.random.normal(keys[15], (f_out,), jnp.float32),
    }
    x = jax.random.normal(keys[16], (B, f_in, H, W), jnp.float32)   # NCHW like PyTorch

    out = grouping_layer_pallas(x, params, kernel_size=ks, iterations=iterations, temp=temp)
    out = jax.block_until_ready(out)

    ref = reference_forward(x, params, ks, iterations, temp)
    assert out.shape == (B, f_out, H // ks, W // ks), out.shape
    assert jnp.allclose(out, ref, atol=2e-3, rtol=2e-3), float(jnp.max(jnp.abs(out - ref)))
    print("KERNEL_OK")
</pallas_src>

<mosaic_0001>
module attributes {stable_mosaic.version = 11 : i64} {
  func.func @kernel(%arg0: i32, %arg1: memref<16x128xf32, #tpu.memory_space<vmem>>, %arg2: memref<8x16xf32, #tpu.memory_space<vmem>>, %arg3: memref<64x16xf32, #tpu.memory_space<vmem>>, %arg4: memref<8x8xf32, #tpu.memory_space<vmem>>, %arg5: memref<8x8xf32, #tpu.memory_space<vmem>>, %arg6: memref<136x1xf32, #tpu.memory_space<vmem>>, %arg7: memref<8x128xf32, #tpu.memory_space<vmem>>) attributes {dimension_semantics = [#tpu.dimension_semantics<parallel>], iteration_bounds = array<i64: 1>, scalar_prefetch = 0 : i64, scratch_operands = 0 : i64, tpu.core_type = #tpu.core_type<tc>, window_params = [{transform_indices = @transform_0, window_bounds = array<i64: 16, 128>}, {pipeline_mode = #tpu.pipeline_mode<synchronous>, transform_indices = @transform_1, window_bounds = array<i64: 8, 16>}, {pipeline_mode = #tpu.pipeline_mode<synchronous>, transform_indices = @transform_2, window_bounds = array<i64: 64, 16>}, {pipeline_mode = #tpu.pipeline_mode<synchronous>, transform_indices = @transform_3, window_bounds = array<i64: 8, 8>}, {pipeline_mode = #tpu.pipeline_mode<synchronous>, transform_indices = @transform_4, window_bounds = array<i64: 8, 8>}, {pipeline_mode = #tpu.pipeline_mode<synchronous>, transform_indices = @transform_5, window_bounds = array<i64: 136, 1>}, {transform_indices = @transform_6, window_bounds = array<i64: 8, 128>}]} {
    %c0 = arith.constant 0 : index
    %c0_0 = arith.constant 0 : index
    %0 = vector.load %arg1[%c0, %c0_0] : memref<16x128xf32, #tpu.memory_space<vmem>>, vector<16x128xf32>
    %c0_1 = arith.constant 0 : index
    %c0_2 = arith.constant 0 : index
    %1 = vector.load %arg6[%c0_1, %c0_2] : memref<136x1xf32, #tpu.memory_space<vmem>>, vector<8x1xf32>
    %c8 = arith.constant 8 : index
    %c0_3 = arith.constant 0 : index
    %2 = vector.load %arg6[%c8, %c0_3] : memref<136x1xf32, #tpu.memory_space<vmem>>, vector<8x1xf32>
    %c16 = arith.constant 16 : index
    %c0_4 = arith.constant 0 : index
    %3 = vector.load %arg6[%c16, %c0_4] : memref<136x1xf32, #tpu.memory_space<vmem>>, vector<8x1xf32>
    %c24 = arith.constant 24 : index
    %c0_5 = arith.constant 0 : index
    %4 = vector.load %arg6[%c24, %c0_5] : memref<136x1xf32, #tpu.memory_space<vmem>>, vector<8x1xf32>
    %c32 = arith.constant 32 : index
    %c0_6 = arith.constant 0 : index
    %5 = vector.load %arg6[%c32, %c0_6] : memref<136x1xf32, #tpu.memory_space<vmem>>, vector<8x1xf32>
    %c40 = arith.constant 40 : index
    %c0_7 = arith.constant 0 : index
    %6 = vector.load %arg6[%c40, %c0_7] : memref<136x1xf32, #tpu.memory_space<vmem>>, vector<8x1xf32>
    %c48 = arith.constant 48 : index
    %c0_8 = arith.constant 0 : index
    %7 = vector.load %arg6[%c48, %c0_8] : memref<136x1xf32, #tpu.memory_space<vmem>>, vector<8x1xf32>
    %c56 = arith.constant 56 : index
    %c0_9 = arith.constant 0 : index
    %8 = vector.load %arg6[%c56, %c0_9] : memref<136x1xf32, #tpu.memory_space<vmem>>, vector<8x1xf32>
    %c64 = arith.constant 64 : index
    %c0_10 = arith.constant 0 : index
    %9 = vector.load %arg6[%c64, %c0_10] : memref<136x1xf32, #tpu.memory_space<vmem>>, vector<8x1xf32>
    %c72 = arith.constant 72 : index
    %c0_11 = arith.constant 0 : index
    %10 = vector.load %arg6[%c72, %c0_11] : memref<136x1xf32, #tpu.memory_space<vmem>>, vector<64x1xf32>
    %c0_12 = arith.constant 0 : index
    %c0_13 = arith.constant 0 : index
    %11 = vector.load %arg2[%c0_12, %c0_13] : memref<8x16xf32, #tpu.memory_space<vmem>>, vector<8x16xf32>
    %cst = arith.constant dense<0.000000e+00> : vector<8x128xf32>
    %12 = tpu.matmul %11, %0, %cst {dimension_numbers = #tpu.dot_dimension_numbers<[1], [0], [0], [1], [0, 0, 1, 1], [], []>} : vector<8x16xf32>, vector<16x128xf32>, vector<8x128xf32> -> vector<8x128xf32>
    %13 = vector.broadcast %1 : vector<8x1xf32> to vector<8x128xf32>
    %14 = arith.addf %12, %13 : vector<8x128xf32>
    %cst_14 = arith.constant dense<0.000000e+00> : vector<128xf32>
    %15 = vector.multi_reduction <add>, %14, %cst_14 [0] : vector<8x128xf32> to vector<128xf32>
    %16 = vector.shape_cast %15 : vector<128xf32> to vector<1x128xf32>
    %cst_15 = arith.constant 8.000000e+00 : f32
    %17 = vector.broadcast %cst_15 : f32 to vector<1x128xf32>
    %18 = arith.divf %16, %17 : vector<1x128xf32>
    %19 = vector.broadcast %18 : vector<1x128xf32> to vector<8x128xf32>
    %20 = arith.subf %14, %19 : vector<8x128xf32>
    %21 = arith.mulf %20, %20 : vector<8x128xf32>
    %cst_16 = arith.constant dense<0.000000e+00> : vector<128xf32>
    %22 = vector.multi_reduction <add>, %21, %cst_16 [0] : vector<8x128xf32> to vector<128xf32>
    %23 = vector.shape_cast %22 : vector<128xf32> to vector<1x128xf32>
    %cst_17 = arith.constant 8.000000e+00 : f32
    %24 = vector.broadcast %cst_17 : f32 to vector<1x128xf32>
    %25 = arith.divf %23, %24 : vector<1x128xf32>
    %26 = vector.broadcast %18 : vector<1x128xf32> to vector<8x128xf32>
    %27 = arith.subf %14, %26 : vector<8x128xf32>
    %cst_18 = arith.constant 9.99999974E-6 : f32
    %28 = vector.broadcast %cst_18 : f32 to vector<1x128xf32>
    %29 = arith.addf %25, %28 : vector<1x128xf32>
    %30 = math.rsqrt %29 : vector<1x128xf32>
    %31 = vector.broadcast %30 : vector<1x128xf32> to vector<8x128xf32>
    %32 = arith.mulf %27, %31 : vector<8x128xf32>
    %33 = vector.broadcast %4 : vector<8x1xf32> to vector<8x128xf32>
    %34 = arith.mulf %32, %33 : vector<8x128xf32>
    %35 = vector.broadcast %5 : vector<8x1xf32> to vector<8x128xf32>
    %36 = arith.addf %34, %35 : vector<8x128xf32>
    %c0_19 = arith.constant 0 : index
    %c0_20 = arith.constant 0 : index
    %37 = vector.load %arg3[%c0_19, %c0_20] : memref<64x16xf32, #tpu.memory_space<vmem>>, vector<64x16xf32>
    %cst_21 = arith.constant dense<0.000000e+00> : vector<64x128xf32>
    %38 = tpu.matmul %37, %0, %cst_21 {dimension_numbers = #tpu.dot_dimension_numbers<[1], [0], [0], [1], [0, 0, 1, 1], [], []>} : vector<64x16xf32>, vector<16x128xf32>, vector<64x128xf32> -> vector<64x128xf32>
    %39 = vector.broadcast %10 : vector<64x1xf32> to vector<64x128xf32>
    %40 = arith.addf %38, %39 : vector<64x128xf32>
    %41 = vector.extract_strided_slice %40 {offsets = [0, 0], sizes = [32, 128], strides = [1, 1]} : vector<64x128xf32> to vector<32x128xf32>
    %42 = vector.shape_cast %41 : vector<32x128xf32> to vector<4x8x128xf32>
    %43 = vector.extract_strided_slice %40 {offsets = [32, 0], sizes = [32, 128], strides = [1, 1]} : vector<64x128xf32> to vector<32x128xf32>
    %44 = vector.shape_cast %43 : vector<32x128xf32> to vector<4x8x128xf32>
    %c0_22 = arith.constant 0 : index
    %c0_23 = arith.constant 0 : index
    %45 = vector.load %arg4[%c0_22, %c0_23] : memref<8x8xf32, #tpu.memory_space<vmem>>, vector<8x8xf32>
    %cst_24 = arith.constant dense<0.000000e+00> : vector<8x128xf32>
    %46 = tpu.matmul %45, %36, %cst_24 {dimension_numbers = #tpu.dot_dimension_numbers<[1], [0], [0], [1], [0, 0, 1, 1], [], []>} : vector<8x8xf32>, vector<8x128xf32>, vector<8x128xf32> -> vector<8x128xf32>
    %47 = vector.broadcast %2 : vector<8x1xf32> to vector<8x128xf32>
    %48 = arith.addf %46, %47 : vector<8x128xf32>
    %49 = vector.shape_cast %48 : vector<8x128xf32> to vector<1x8x128xf32>
    %50 = vector.broadcast %49 : vector<1x8x128xf32> to vector<4x8x128xf32>
    %51 = arith.mulf %42, %50 : vector<4x8x128xf32>
    %cst_25 = arith.constant dense<0.000000e+00> : vector<4x128xf32>
    %52 = vector.multi_reduction <add>, %51, %cst_25 [1] : vector<4x8x128xf32> to vector<4x128xf32>
    %cst_26 = arith.constant 1.000000e+00 : f32
    %53 = vector.broadcast %cst_26 : f32 to vector<4x128xf32>
    %54 = arith.mulf %53, %52 : vector<4x128xf32>
    %cst_27 = arith.constant dense<0xFF800000> : vector<128xf32>
    %55 = vector.multi_reduction <maximumf>, %54, %cst_27 [0] : vector<4x128xf32> to vector<128xf32>
    %56 = vector.shape_cast %55 : vector<128xf32> to vector<1x128xf32>
    %57 = vector.broadcast %56 : vector<1x128xf32> to vector<4x128xf32>
    %58 = arith.subf %54, %57 : vector<4x128xf32>
    %59 = math.exp %58 : vector<4x128xf32>
    %cst_28 = arith.constant dense<0.000000e+00> : vector<128xf32>
    %60 = vector.multi_reduction <add>, %59, %cst_28 [0] : vector<4x128xf32> to vector<128xf32>
    %61 = vector.shape_cast %60 : vector<128xf32> to vector<1x128xf32>
    %62 = tpu.reciprocal %61 : vector<1x128xf32> -> vector<1x128xf32>
    %63 = vector.broadcast %62 : vector<1x128xf32> to vector<4x128xf32>
    %64 = arith.mulf %59, %63 : vector<4x128xf32>
    %65 = vector.shape_cast %64 : vector<4x128xf32> to vector<4x1x128xf32>
    %66 = vector.broadcast %65 : vector<4x1x128xf32> to vector<4x8x128xf32>
    %67 = arith.mulf %66, %44 : vector<4x8x128xf32>
    %cst_29 = arith.constant dense<0.000000e+00> : vector<8x128xf32>
    %68 = vector.multi_reduction <add>, %67, %cst_29 [0] : vector<4x8x128xf32> to vector<8x128xf32>
    %cst_30 = arith.constant dense<0.000000e+00> : vector<128xf32>
    %69 = vector.multi_reduction <add>, %68, %cst_30 [0] : vector<8x128xf32> to vector<128xf32>
    %70 = vector.shape_cast %69 : vector<128xf32> to vector<1x128xf32>
    %cst_31 = arith.constant 8.000000e+00 : f32
    %71 = vector.broadcast %cst_31 : f32 to vector<1x128xf32>
    %72 = arith.divf %70, %71 : vector<1x128xf32>
    %73 = vector.broadcast %72 : vector<1x128xf32> to vector<8x128xf32>
    %74 = arith.subf %68, %73 : vector<8x128xf32>
    %75 = arith.mulf %74, %74 : vector<8x128xf32>
    %cst_32 = arith.constant dense<0.000000e+00> : vector<128xf32>
    %76 = vector.multi_reduction <add>, %75, %cst_32 [0] : vector<8x128xf32> to vector<128xf32>
    %77 = vector.shape_cast %76 : vector<128xf32> to vector<1x128xf32>
    %cst_33 = arith.constant 8.000000e+00 : f32
    %78 = vector.broadcast %cst_33 : f32 to vector<1x128xf32>
    %79 = arith.divf %77, %78 : vector<1x128xf32>
    %80 = vector.broadcast %72 : vector<1x128xf32> to vector<8x128xf32>
    %81 = arith.subf %68, %80 : vector<8x128xf32>
    %cst_34 = arith.constant 9.99999974E-6 : f32
    %82 = vector.broadcast %cst_34 : f32 to vector<1x128xf32>
    %83 = arith.addf %79, %82 : vector<1x128xf32>
    %84 = math.rsqrt %83 : vector<1x128xf32>
    %85 = vector.broadcast %84 : vector<1x128xf32> to vector<8x128xf32>
    %86 = arith.mulf %81, %85 : vector<8x128xf32>
    %87 = vector.broadcast %6 : vector<8x1xf32> to vector<8x128xf32>
    %88 = arith.mulf %86, %87 : vector<8x128xf32>
    %89 = vector.broadcast %7 : vector<8x1xf32> to vector<8x128xf32>
    %90 = arith.addf %88, %89 : vector<8x128xf32>
    %91 = arith.addf %36, %90 : vector<8x128xf32>
    %c0_35 = arith.constant 0 : index
    %c0_36 = arith.constant 0 : index
    %92 = vector.load %arg5[%c0_35, %c0_36] : memref<8x8xf32, #tpu.memory_space<vmem>>, vector<8x8xf32>
    %cst_37 = arith.constant dense<0.000000e+00> : vector<8x128xf32>
    %93 = tpu.matmul %92, %91, %cst_37 {dimension_numbers = #tpu.dot_dimension_numbers<[1], [0], [0], [1], [0, 0, 1, 1], [], []>} : vector<8x8xf32>, vector<8x128xf32>, vector<8x128xf32> -> vector<8x128xf32>
    %94 = vector.broadcast %3 : vector<8x1xf32> to vector<8x128xf32>
    %95 = arith.addf %93, %94 : vector<8x128xf32>
    %cst_38 = arith.constant dense<0.000000e+00> : vector<128xf32>
    %96 = vector.multi_reduction <add>, %95, %cst_38 [0] : vector<8x128xf32> to vector<128xf32>
    %97 = vector.shape_cast %96 : vector<128xf32> to vector<1x128xf32>
    %cst_39 = arith.constant 8.000000e+00 : f32
    %98 = vector.broadcast %cst_39 : f32 to vector<1x128xf32>
    %99 = arith.divf %97, %98 : vector<1x128xf32>
    %100 = vector.broadcast %99 : vector<1x128xf32> to vector<8x128xf32>
    %101 = arith.subf %95, %100 : vector<8x128xf32>
    %102 = arith.mulf %101, %101 : vector<8x128xf32>
    %cst_40 = arith.constant dense<0.000000e+00> : vector<128xf32>
    %103 = vector.multi_reduction <add>, %102, %cst_40 [0] : vector<8x128xf32> to vector<128xf32>
    %104 = vector.shape_cast %103 : vector<128xf32> to vector<1x128xf32>
    %cst_41 = arith.constant 8.000000e+00 : f32
    %105 = vector.broadcast %cst_41 : f32 to vector<1x128xf32>
    %106 = arith.divf %104, %105 : vector<1x128xf32>
    %107 = vector.broadcast %99 : vector<1x128xf32> to vector<8x128xf32>
    %108 = arith.subf %95, %107 : vector<8x128xf32>
    %cst_42 = arith.constant 9.99999974E-6 : f32
    %109 = vector.broadcast %cst_42 : f32 to vector<1x128xf32>
    %110 = arith.addf %106, %109 : vector<1x128xf32>
    %111 = math.rsqrt %110 : vector<1x128xf32>
    %112 = vector.broadcast %111 : vector<1x128xf32> to vector<8x128xf32>
    %113 = arith.mulf %108, %112 : vector<8x128xf32>
    %114 = vector.broadcast %8 : vector<8x1xf32> to vector<8x128xf32>
    %115 = arith.mulf %113, %114 : vector<8x128xf32>
    %116 = vector.broadcast %9 : vector<8x1xf32> to vector<8x128xf32>
    %117 = arith.addf %115, %116 : vector<8x128xf32>
    %118 = arith.addf %91, %117 : vector<8x128xf32>
    %c0_43 = arith.constant 0 : index
    %c0_44 = arith.constant 0 : index
    %119 = vector.load %arg4[%c0_43, %c0_44] : memref<8x8xf32, #tpu.memory_space<vmem>>, vector<8x8xf32>
    %cst_45 = arith.constant dense<0.000000e+00> : vector<8x128xf32>
    %120 = tpu.matmul %119, %118, %cst_45 {dimension_numbers = #tpu.dot_dimension_numbers<[1], [0], [0], [1], [0, 0, 1, 1], [], []>} : vector<8x8xf32>, vector<8x128xf32>, vector<8x128xf32> -> vector<8x128xf32>
    %121 = vector.broadcast %2 : vector<8x1xf32> to vector<8x128xf32>
    %122 = arith.addf %120, %121 : vector<8x128xf32>
    %123 = vector.shape_cast %122 : vector<8x128xf32> to vector<1x8x128xf32>
    %124 = vector.broadcast %123 : vector<1x8x128xf32> to vector<4x8x128xf32>
    %125 = arith.mulf %42, %124 : vector<4x8x128xf32>
    %cst_46 = arith.constant dense<0.000000e+00> : vector<4x128xf32>
    %126 = vector.multi_reduction <add>, %125, %cst_46 [1] : vector<4x8x128xf32> to vector<4x128xf32>
    %cst_47 = arith.constant 1.000000e+00 : f32
    %127 = vector.broadcast %cst_47 : f32 to vector<4x128xf32>
    %128 = arith.mulf %127, %126 : vector<4x128xf32>
    %cst_48 = arith.constant dense<0xFF800000> : vector<128xf32>
    %129 = vector.multi_reduction <maximumf>, %128, %cst_48 [0] : vector<4x128xf32> to vector<128xf32>
    %130 = vector.shape_cast %129 : vector<128xf32> to vector<1x128xf32>
    %131 = vector.broadcast %130 : vector<1x128xf32> to vector<4x128xf32>
    %132 = arith.subf %128, %131 : vector<4x128xf32>
    %133 = math.exp %132 : vector<4x128xf32>
    %cst_49 = arith.constant dense<0.000000e+00> : vector<128xf32>
    %134 = vector.multi_reduction <add>, %133, %cst_49 [0] : vector<4x128xf32> to vector<128xf32>
    %135 = vector.shape_cast %134 : vector<128xf32> to vector<1x128xf32>
    %136 = tpu.reciprocal %135 : vector<1x128xf32> -> vector<1x128xf32>
    %137 = vector.broadcast %136 : vector<1x128xf32> to vector<4x128xf32>
    %138 = arith.mulf %133, %137 : vector<4x128xf32>
    %139 = vector.shape_cast %138 : vector<4x128xf32> to vector<4x1x128xf32>
    %140 = vector.broadcast %139 : vector<4x1x128xf32> to vector<4x8x128xf32>
    %141 = arith.mulf %140, %44 : vector<4x8x128xf32>
    %cst_50 = arith.constant dense<0.000000e+00> : vector<8x128xf32>
    %142 = vector.multi_reduction <add>, %141, %cst_50 [0] : vector<4x8x128xf32> to vector<8x128xf32>
    %cst_51 = arith.constant dense<0.000000e+00> : vector<128xf32>
    %143 = vector.multi_reduction <add>, %142, %cst_51 [0] : vector<8x128xf32> to vector<128xf32>
    %144 = vector.shape_cast %143 : vector<128xf32> to vector<1x128xf32>
    %cst_52 = arith.constant 8.000000e+00 : f32
    %145 = vector.broadcast %cst_52 : f32 to vector<1x128xf32>
    %146 = arith.divf %144, %145 : vector<1x128xf32>
    %147 = vector.broadcast %146 : vector<1x128xf32> to vector<8x128xf32>
    %148 = arith.subf %142, %147 : vector<8x128xf32>
    %149 = arith.mulf %148, %148 : vector<8x128xf32>
    %cst_53 = arith.constant dense<0.000000e+00> : vector<128xf32>
    %150 = vector.multi_reduction <add>, %149, %cst_53 [0] : vector<8x128xf32> to vector<128xf32>
    %151 = vector.shape_cast %150 : vector<128xf32> to vector<1x128xf32>
    %cst_54 = arith.constant 8.000000e+00 : f32
    %152 = vector.broadcast %cst_54 : f32 to vector<1x128xf32>
    %153 = arith.divf %151, %152 : vector<1x128xf32>
    %154 = vector.broadcast %146 : vector<1x128xf32> to vector<8x128xf32>
    %155 = arith.subf %142, %154 : vector<8x128xf32>
    %cst_55 = arith.constant 9.99999974E-6 : f32
    %156 = vector.broadcast %cst_55 : f32 to vector<1x128xf32>
    %157 = arith.addf %153, %156 : vector<1x128xf32>
    %158 = math.rsqrt %157 : vector<1x128xf32>
    %159 = vector.broadcast %158 : vector<1x128xf32> to vector<8x128xf32>
    %160 = arith.mulf %155, %159 : vector<8x128xf32>
    %161 = vector.broadcast %6 : vector<8x1xf32> to vector<8x128xf32>
    %162 = arith.mulf %160, %161 : vector<8x128xf32>
    %163 = vector.broadcast %7 : vector<8x1xf32> to vector<8x128xf32>
    %164 = arith.addf %162, %163 : vector<8x128xf32>
    %165 = arith.addf %118, %164 : vector<8x128xf32>
    %c0_56 = arith.constant 0 : index
    %c0_57 = arith.constant 0 : index
    %166 = vector.load %arg5[%c0_56, %c0_57] : memref<8x8xf32, #tpu.memory_space<vmem>>, vector<8x8xf32>
    %cst_58 = arith.constant dense<0.000000e+00> : vector<8x128xf32>
    %167 = tpu.matmul %166, %165, %cst_58 {dimension_numbers = #tpu.dot_dimension_numbers<[1], [0], [0], [1], [0, 0, 1, 1], [], []>} : vector<8x8xf32>, vector<8x128xf32>, vector<8x128xf32> -> vector<8x128xf32>
    %168 = vector.broadcast %3 : vector<8x1xf32> to vector<8x128xf32>
    %169 = arith.addf %167, %168 : vector<8x128xf32>
    %cst_59 = arith.constant dense<0.000000e+00> : vector<128xf32>
    %170 = vector.multi_reduction <add>, %169, %cst_59 [0] : vector<8x128xf32> to vector<128xf32>
    %171 = vector.shape_cast %170 : vector<128xf32> to vector<1x128xf32>
    %cst_60 = arith.constant 8.000000e+00 : f32
    %172 = vector.broadcast %cst_60 : f32 to vector<1x128xf32>
    %173 = arith.divf %171, %172 : vector<1x128xf32>
    %174 = vector.broadcast %173 : vector<1x128xf32> to vector<8x128xf32>
    %175 = arith.subf %169, %174 : vector<8x128xf32>
    %176 = arith.mulf %175, %175 : vector<8x128xf32>
    %cst_61 = arith.constant dense<0.000000e+00> : vector<128xf32>
    %177 = vector.multi_reduction <add>, %176, %cst_61 [0] : vector<8x128xf32> to vector<128xf32>
    %178 = vector.shape_cast %177 : vector<128xf32> to vector<1x128xf32>
    %cst_62 = arith.constant 8.000000e+00 : f32
    %179 = vector.broadcast %cst_62 : f32 to vector<1x128xf32>
    %180 = arith.divf %178, %179 : vector<1x128xf32>
    %181 = vector.broadcast %173 : vector<1x128xf32> to vector<8x128xf32>
    %182 = arith.subf %169, %181 : vector<8x128xf32>
    %cst_63 = arith.constant 9.99999974E-6 : f32
    %183 = vector.broadcast %cst_63 : f32 to vector<1x128xf32>
    %184 = arith.addf %180, %183 : vector<1x128xf32>
    %185 = math.rsqrt %184 : vector<1x128xf32>
    %186 = vector.broadcast %185 : vector<1x128xf32> to vector<8x128xf32>
    %187 = arith.mulf %182, %186 : vector<8x128xf32>
    %188 = vector.broadcast %8 : vector<8x1xf32> to vector<8x128xf32>
    %189 = arith.mulf %187, %188 : vector<8x128xf32>
    %190 = vector.broadcast %9 : vector<8x1xf32> to vector<8x128xf32>
    %191 = arith.addf %189, %190 : vector<8x128xf32>
    %192 = arith.addf %165, %191 : vector<8x128xf32>
    %c0_64 = arith.constant 0 : index
    %c0_65 = arith.constant 0 : index
    %193 = vector.load %arg4[%c0_64, %c0_65] : memref<8x8xf32, #tpu.memory_space<vmem>>, vector<8x8xf32>
    %cst_66 = arith.constant dense<0.000000e+00> : vector<8x128xf32>
    %194 = tpu.matmul %193, %192, %cst_66 {dimension_numbers = #tpu.dot_dimension_numbers<[1], [0], [0], [1], [0, 0, 1, 1], [], []>} : vector<8x8xf32>, vector<8x128xf32>, vector<8x128xf32> -> vector<8x128xf32>
    %195 = vector.broadcast %2 : vector<8x1xf32> to vector<8x128xf32>
    %196 = arith.addf %194, %195 : vector<8x128xf32>
    %197 = vector.shape_cast %196 : vector<8x128xf32> to vector<1x8x128xf32>
    %198 = vector.broadcast %197 : vector<1x8x128xf32> to vector<4x8x128xf32>
    %199 = arith.mulf %42, %198 : vector<4x8x128xf32>
    %cst_67 = arith.constant dense<0.000000e+00> : vector<4x128xf32>
    %200 = vector.multi_reduction <add>, %199, %cst_67 [1] : vector<4x8x128xf32> to vector<4x128xf32>
    %cst_68 = arith.constant 1.000000e+00 : f32
    %201 = vector.broadcast %cst_68 : f32 to vector<4x128xf32>
    %202 = arith.mulf %201, %200 : vector<4x128xf32>
    %cst_69 = arith.constant dense<0xFF800000> : vector<128xf32>
    %203 = vector.multi_reduction <maximumf>, %202, %cst_69 [0] : vector<4x128xf32> to vector<128xf32>
    %204 = vector.shape_cast %203 : vector<128xf32> to vector<1x128xf32>
    %205 = vector.broadcast %204 : vector<1x128xf32> to vector<4x128xf32>
    %206 = arith.subf %202, %205 : vector<4x128xf32>
    %207 = math.exp %206 : vector<4x128xf32>
    %cst_70 = arith.constant dense<0.000000e+00> : vector<128xf32>
    %208 = vector.multi_reduction <add>, %207, %cst_70 [0] : vector<4x128xf32> to vector<128xf32>
    %209 = vector.shape_cast %208 : vector<128xf32> to vector<1x128xf32>
    %210 = tpu.reciprocal %209 : vector<1x128xf32> -> vector<1x128xf32>
    %211 = vector.broadcast %210 : vector<1x128xf32> to vector<4x128xf32>
    %212 = arith.mulf %207, %211 : vector<4x128xf32>
    %213 = vector.shape_cast %212 : vector<4x128xf32> to vector<4x1x128xf32>
    %214 = vector.broadcast %213 : vector<4x1x128xf32> to vector<4x8x128xf32>
    %215 = arith.mulf %214, %44 : vector<4x8x128xf32>
    %cst_71 = arith.constant dense<0.000000e+00> : vector<8x128xf32>
    %216 = vector.multi_reduction <add>, %215, %cst_71 [0] : vector<4x8x128xf32> to vector<8x128xf32>
    %cst_72 = arith.constant dense<0.000000e+00> : vector<128xf32>
    %217 = vector.multi_reduction <add>, %216, %cst_72 [0] : vector<8x128xf32> to vector<128xf32>
    %218 = vector.shape_cast %217 : vector<128xf32> to vector<1x128xf32>
    %cst_73 = arith.constant 8.000000e+00 : f32
    %219 = vector.broadcast %cst_73 : f32 to vector<1x128xf32>
    %220 = arith.divf %218, %219 : vector<1x128xf32>
    %221 = vector.broadcast %220 : vector<1x128xf32> to vector<8x128xf32>
    %222 = arith.subf %216, %221 : vector<8x128xf32>
    %223 = arith.mulf %222, %222 : vector<8x128xf32>
    %cst_74 = arith.constant dense<0.000000e+00> : vector<128xf32>
    %224 = vector.multi_reduction <add>, %223, %cst_74 [0] : vector<8x128xf32> to vector<128xf32>
    %225 = vector.shape_cast %224 : vector<128xf32> to vector<1x128xf32>
    %cst_75 = arith.constant 8.000000e+00 : f32
    %226 = vector.broadcast %cst_75 : f32 to vector<1x128xf32>
    %227 = arith.divf %225, %226 : vector<1x128xf32>
    %228 = vector.broadcast %220 : vector<1x128xf32> to vector<8x128xf32>
    %229 = arith.subf %216, %228 : vector<8x128xf32>
    %cst_76 = arith.constant 9.99999974E-6 : f32
    %230 = vector.broadcast %cst_76 : f32 to vector<1x128xf32>
    %231 = arith.addf %227, %230 : vector<1x128xf32>
    %232 = math.rsqrt %231 : vector<1x128xf32>
    %233 = vector.broadcast %232 : vector<1x128xf32> to vector<8x128xf32>
    %234 = arith.mulf %229, %233 : vector<8x128xf32>
    %235 = vector.broadcast %6 : vector<8x1xf32> to vector<8x128xf32>
    %236 = arith.mulf %234, %235 : vector<8x128xf32>
    %237 = vector.broadcast %7 : vector<8x1xf32> to vector<8x128xf32>
    %238 = arith.addf %236, %237 : vector<8x128xf32>
    %239 = arith.addf %192, %238 : vector<8x128xf32>
    %c0_77 = arith.constant 0 : index
    %c0_78 = arith.constant 0 : index
    %240 = vector.load %arg5[%c0_77, %c0_78] : memref<8x8xf32, #tpu.memory_space<vmem>>, vector<8x8xf32>
    %cst_79 = arith.constant dense<0.000000e+00> : vector<8x128xf32>
    %241 = tpu.matmul %240, %239, %cst_79 {dimension_numbers = #tpu.dot_dimension_numbers<[1], [0], [0], [1], [0, 0, 1, 1], [], []>} : vector<8x8xf32>, vector<8x128xf32>, vector<8x128xf32> -> vector<8x128xf32>
    %242 = vector.broadcast %3 : vector<8x1xf32> to vector<8x128xf32>
    %243 = arith.addf %241, %242 : vector<8x128xf32>
    %cst_80 = arith.constant dense<0.000000e+00> : vector<128xf32>
    %244 = vector.multi_reduction <add>, %243, %cst_80 [0] : vector<8x128xf32> to vector<128xf32>
    %245 = vector.shape_cast %244 : vector<128xf32> to vector<1x128xf32>
    %cst_81 = arith.constant 8.000000e+00 : f32
    %246 = vector.broadcast %cst_81 : f32 to vector<1x128xf32>
    %247 = arith.divf %245, %246 : vector<1x128xf32>
    %248 = vector.broadcast %247 : vector<1x128xf32> to vector<8x128xf32>
    %249 = arith.subf %243, %248 : vector<8x128xf32>
    %250 = arith.mulf %249, %249 : vector<8x128xf32>
    %cst_82 = arith.constant dense<0.000000e+00> : vector<128xf32>
    %251 = vector.multi_reduction <add>, %250, %cst_82 [0] : vector<8x128xf32> to vector<128xf32>
    %252 = vector.shape_cast %251 : vector<128xf32> to vector<1x128xf32>
    %cst_83 = arith.constant 8.000000e+00 : f32
    %253 = vector.broadcast %cst_83 : f32 to vector<1x128xf32>
    %254 = arith.divf %252, %253 : vector<1x128xf32>
    %255 = vector.broadcast %247 : vector<1x128xf32> to vector<8x128xf32>
    %256 = arith.subf %243, %255 : vector<8x128xf32>
    %cst_84 = arith.constant 9.99999974E-6 : f32
    %257 = vector.broadcast %cst_84 : f32 to vector<1x128xf32>
    %258 = arith.addf %254, %257 : vector<1x128xf32>
    %259 = math.rsqrt %258 : vector<1x128xf32>
    %260 = vector.broadcast %259 : vector<1x128xf32> to vector<8x128xf32>
    %261 = arith.mulf %256, %260 : vector<8x128xf32>
    %262 = vector.broadcast %8 : vector<8x1xf32> to vector<8x128xf32>
    %263 = arith.mulf %261, %262 : vector<8x128xf32>
    %264 = vector.broadcast %9 : vector<8x1xf32> to vector<8x128xf32>
    %265 = arith.addf %263, %264 : vector<8x128xf32>
    %266 = arith.addf %239, %265 : vector<8x128xf32>
    %c0_85 = arith.constant 0 : index
    %c0_86 = arith.constant 0 : index
    %267 = vector.load %arg7[%c0_85, %c0_86] : memref<8x128xf32, #tpu.memory_space<vmem>>, vector<8x128xf32>
    tpu.vector_store %arg7[%c0_85, %c0_86], %266 {strides = array<i32>} : memref<8x128xf32, #tpu.memory_space<vmem>>, vector<8x128xf32>,
    return
  }
  func.func @transform_0(%arg0: i32) -> (i32, i32) {
    %c0_i32 = arith.constant 0 : i32
    %c0_i32_0 = arith.constant 0 : i32
    return %c0_i32, %arg0 : i32, i32
  }
  func.func @transform_1(%arg0: i32) -> (i32, i32) {
    %c0_i32 = arith.constant 0 : i32
    %c0_i32_0 = arith.constant 0 : i32
    %c0_i32_1 = arith.constant 0 : i32
    return %c0_i32, %c0_i32_0 : i32, i32
  }
  func.func @transform_2(%arg0: i32) -> (i32, i32) {
    %c0_i32 = arith.constant 0 : i32
    %c0_i32_0 = arith.constant 0 : i32
    %c0_i32_1 = arith.constant 0 : i32
    return %c0_i32, %c0_i32_0 : i32, i32
  }
  func.func @transform_3(%arg0: i32) -> (i32, i32) {
    %c0_i32 = arith.constant 0 : i32
    %c0_i32_0 = arith.constant 0 : i32
    %c0_i32_1 = arith.constant 0 : i32
    return %c0_i32, %c0_i32_0 : i32, i32
  }
  func.func @transform_4(%arg0: i32) -> (i32, i32) {
    %c0_i32 = arith.constant 0 : i32
    %c0_i32_0 = arith.constant 0 : i32
    %c0_i32_1 = arith.constant 0 : i32
    return %c0_i32, %c0_i32_0 : i32, i32
  }
  func.func @transform_5(%arg0: i32) -> (i32, i32) {
    %c0_i32 = arith.constant 0 : i32
    %c0_i32_0 = arith.constant 0 : i32
    %c0_i32_1 = arith.constant 0 : i32
    return %c0_i32, %c0_i32_0 : i32, i32
  }
  func.func @transform_6(%arg0: i32) -> (i32, i32) {
    %c0_i32 = arith.constant 0 : i32
    %c0_i32_0 = arith.constant 0 : i32
    return %c0_i32, %arg0 : i32, i32
  }
}

</mosaic_0001>

<bundles_post_ra>
// kernel: tpu_custom_call.1
= control target key start
LH: loop header
LB: loop body
LE: loop exit
PB: predicated region body
PF: predicated region fallthrough
CT: control target
= control target key end

     0   :  { %v1396_v2 = vmov 0.0|0.0   ;;  %vm1397_vm0 = vmmov 0   ;;  %v1398_v4 = vmov 0.0   ;;  %vm49_vm1 = vcmask 130048   ;;  %s1706_s0 = inlined_call_operand.vmem [shape: f32[16,128], index: 0, kind: input, shape index: {}]   ;;  %s1707_s1 = inlined_call_operand.vmem [shape: f32[8,16], index: 1, kind: input, shape index: {}]   ;;  %s1708_s2 = inlined_call_operand.vmem [shape: f32[64,16], index: 2, kind: input, shape index: {}]   ;;  %s1709_s3 = inlined_call_operand.vmem [shape: f32[8,8], index: 3, kind: input, shape index: {}]   ;;  %s1710_s4 = inlined_call_operand.vmem [shape: f32[8,8], index: 4, kind: input, shape index: {}]   ;;  %s1711_s5 = inlined_call_operand.vmem [shape: f32[136,1], index: 5, kind: input, shape index: {}]   ;;  %s1712_s6 = inlined_call_operand.hbm [shape: f32[8,128], index: 6, kind: output, shape index: {}]  }
   0x1   :  { %v24_v0 = vld [vmem:[%s1706_s0] sm:$0xff]  ;;  %v25_v1 = vld [vmem:[%s1706_s0 + $0x8] sm:$0xff]  ;;  %1314 = vmatprep.subr.bf16.mxu0 %v1396_v2  ;;  %1265 = vmatprep.mubr.msk.f32.mxu0 %vm1397_vm0, %v1398_v4  ;;  %v1399_v6 = vmov 0   ;;  %v157_v10 = vld [vmem:[%s1708_s2 + $0x10] sm:$0xff] }
   0x2   :  { %v1315_v3 = vpack.c.bf16 %v25_v1, %v24_v0  ;;  %v155_v5 = vld [vmem:[%s1708_s2] sm:$0xff]  ;;  %1326 = vset.pattern.permute.xlu0 %v1399_v6  ;;  %v156_v9 = vld [vmem:[%s1708_s2 + $0x8] sm:$0xff]  ;;  %v29_v11 = vld [vmem:[%s1711_s5 + $0x18] sm:$0xff]  ;;  %1327 = vset.pattern.permute.xlu1 %v1399_v6 }
   0x3   :  { %1272 = vmatprep.mubr.msk.f32.mxu1 %vm49_vm1, %v155_v5  ;;  %v43_v7 = vld [vmem:[%s1707_s1] sm:$0xff]  ;;  %v158_v13 = vld [vmem:[%s1708_s2 + $0x18] sm:$0xff]  ;;  %v35_v14 = vld [vmem:[%s1711_s5 + $0x48] sm:$0xff] }
   0x4   :  { %1316 = vmatpush3.bf16.msra.mxu0 %v1315_v3  ;;  %1318 = vmatprep.subr.bf16.mxu1 %v1315_v3  ;;  %v26_v8 = vld [vmem:[%s1711_s5] sm:$0xff]  ;;  %v36_v16 = vld [vmem:[%s1711_s5 + $0x50] sm:$0xff] }
   0x5   :  { %1320 = vmatpush3.bf16.msra.mxu1 %v1315_v3  ;;  %46 = vperm.xlu0 %1326, %v26_v8   ;;  %v30_v12 = vld [vmem:[%s1711_s5 + $0x20] sm:$0xff] }
   0x6   :  { %1284 = vmatprep.subr.mxu0 %v1398_v4  ;;  %1304 = vmatprep.subr.mxu1 %v1398_v4  ;;  %v159_v15 = vld [vmem:[%s1708_s2 + $0x20] sm:$0xff] }
   0x7   :  { %1266 = vmatmul.mubr.msk.f32.vlgmr.msra.gmra.mrb[0].mxu0 %vm49_vm1, %v43_v7  ;;  %151 = vperm.xlu1 %1327, %v30_v12  }
   0x8   :  { %1273 = vmatmul.mubr.msk.f32.vlgmr.msra.gmra.mrb[0].mxu1 %vm49_vm1, %v156_v9  ;;  %1286 = vmatprep.mubr.msk.f32.mxu0 %vm1397_vm0, %v1398_v4 }
   0x9   :  { %1275 = vmatprep.mubr.msk.f32.mxu1 %vm49_vm1, %v157_v10  ;;  %145 = vperm.xlu0 %1326, %v29_v11  }
   0xa   :  { %11 = vsyncpa [#allocation3], 0  ;;  %v160_v17 = vld [vmem:[%s1708_s2 + $0x28] sm:$0xff]  ;;  %v37_v18 = vld [vmem:[%s1711_s5 + $0x58] sm:$0xff]  ;;  %vm338_vm2 = vcmask 64512   ;;  %vm460_vm3 = vcmask 1041409  }
   0xb   :  { %165 = vperm.xlu1 %1327, %v35_v14   ;;  %v161_v19 = vld [vmem:[%s1708_s2 + $0x30] sm:$0xff]  ;;  %v38_v20 = vld [vmem:[%s1711_s5 + $0x60] sm:$0xff]  ;;  %v162_v21 = vld [vmem:[%s1708_s2 + $0x38] sm:$0xff]  ;;  %vm463_vm4 = vcmask 1042434   ;;  %vm466_vm5 = vcmask 1043459   ;;  %vm469_vm6 = vcmask 1043456  }
   0xc   :  { %1276 = vmatmul.mubr.msk.f32.gmra.mrb[2].mxu1 %vm49_vm1, %v158_v13  ;;  %v27_v22 = vld [vmem:[%s1711_s5 + $0x8] sm:$0xff]  ;;  %v40_v24 = vld [vmem:[%s1711_s5 + $0x70] sm:$0xff]  ;;  %v41_v25 = vld [vmem:[%s1711_s5 + $0x78] sm:$0xff] }
   0xd   :  { %1278 = vmatprep.mubr.msk.f32.mxu1 %vm49_vm1, %v159_v15  ;;  %170 = vperm.xlu0 %1326, %v36_v16   ;;  %v39_v23 = vld [vmem:[%s1711_s5 + $0x68] sm:$0xff]  ;;  %v42_v26 = vld [vmem:[%s1711_s5 + $0x80] sm:$0xff]  ;;  %v32_v28 = vld [vmem:[%s1711_s5 + $0x30] sm:$0xff] }
   0xe   :  { %v31_v27 = vld [vmem:[%s1711_s5 + $0x28] sm:$0xff]  ;;  %v28_v29 = vld [vmem:[%s1711_s5 + $0x10] sm:$0xff]  ;;  %v33_v30 = vld [vmem:[%s1711_s5 + $0x38] sm:$0xff] }
   0xf   :  { %175 = vperm.xlu1 %1327, %v37_v18   ;;  %v34_v31 = vld [vmem:[%s1711_s5 + $0x40] sm:$0xff] }
  0x10   :  { %1279 = vmatmul.mubr.msk.f32.gmra.mrb[4].mxu1 %vm49_vm1, %v160_v17  ;;  %v1550_v3 = vld [vmem:[%s1709_s3] sm:$0xff] }
  0x11   :  { %1281 = vmatprep.mubr.msk.f32.mxu1 %vm49_vm1, %v161_v19  ;;  %180 = vperm.xlu0 %1326, %v38_v20  }
  0x13   :  { %335 = vperm.xlu1 %1327, %v27_v22  }
  0x14   :  { %1282 = vmatmul.mubr.msk.f32.gmra.mrb[6].mxu1 %vm49_vm1, %v162_v21 }
  0x15   :  { %185 = vperm.xlu0 %1326, %v39_v23   ;;  %1306 = vmatprep.mubr.msk.f32.mxu1 %vm1397_vm0, %v1398_v4 }
  0x17   :  { %190 = vperm.xlu1 %1327, %v40_v24  }
  0x19   :  { %195 = vperm.xlu0 %1326, %v41_v25  }
  0x1b   :  { %200 = vperm.xlu1 %1327, %v42_v26  }
  0x1d   :  { %530 = vperm.xlu0 %1326, %v31_v27  }
  0x1f   :  { %536 = vperm.xlu1 %1327, %v32_v28  }
  0x21   :  { %544 = vperm.xlu0 %1326, %v28_v29  }
  0x23   :  { %641 = vperm.xlu1 %1327, %v33_v30  }
  0x25   :  { %647 = vperm.xlu0 %1326, %v34_v31  }
  0x84   :  { %v47_v32 = vpop.permute.xlu0 %46 }
  0x86   :  { %v152_v1 = vpop.permute.xlu1 %151 }
  0x88   :  { %v146_v63 = vpop.permute.xlu0 %145 }
  0x8a   :  { %v166_v5 = vpop.permute.xlu1 %165 }
  0x8c   :  { %v171_v6 = vpop.permute.xlu0 %170 }
  0x8e   :  { %v176_v7 = vpop.permute.xlu1 %175 }
  0x90   :  { %v181_v8 = vpop.permute.xlu0 %180 }
  0x92   :  { %v1560_v10 = vpop.permute.xlu1 %335 }
  0xda   :  { %v119_v33 = vpop.f32.mrb[0].mxu0 }
  0xdb   :  { %v120_v34 = vadd.f32 %v119_v33, %v47_v32  ;;  %v1267_v35 = vpop.f32.mrb[1].mxu0  ;;  %v1274_v36 = vpop.f32.mrb[0].mxu1 }
  0xdc   :  { %v293_v37 = vpop.f32.mrb[1].mxu1  ;;  %v1558_v9 = vadd.f32 %v1274_v36, %v171_v6 }
  0xdd   :  { %v123_v38 = vrot.slane %v120_v34, 4  ;;  %v1564_v13 = vadd.f32 %v293_v37, %v166_v5 }
  0xdf   :  { %v124_v39 = vadd.f32 %v123_v38, %v120_v34  ;;  %v1277_v40 = vpop.f32.mrb[2].mxu1 }
  0xe0   :  { %v303_v41 = vpop.f32.mrb[3].mxu1  ;;  %v1562_v12 = vadd.f32 %v1277_v40, %v181_v8 }
  0xe1   :  { %v125_v42 = vrot.slane %v124_v39, 2  ;;  %v1566_v14 = vadd.f32 %v303_v41, %v176_v7 }
  0xe3   :  { %v126_v43 = vadd.f32 %v125_v42, %v124_v39  ;;  %v1537_v44 = vpop.f32.mrb[4].mxu1 }
  0xe4   :  { %v1539_v45 = vpop.f32.mrb[5].mxu1 }
  0xe5   :  { %v127_v46 = vrot.slane %v126_v43, 1 }
  0xe7   :  { %v128_v47 = vadd.f32 %v127_v46, %v126_v43  ;;  %v1541_v48 = vpop.f32.mrb[6].mxu1 }
  0xe8   :  { %v1543_v49 = vpop.f32.mrb[7].mxu1 }
  0xe9   :  { %v130_v50 = vmul.f32 0.125, %v128_v47 }
  0xeb   :  { %v131_v51 = vsub.f32 %v120_v34, %v130_v50 }
  0xed   :  { %v132_v52 = vmul.f32 %v131_v51, %v131_v51 }
  0xef   :  { %v133_v53 = vrot.slane %v132_v52, 4 }
  0xf1   :  { %v134_v54 = vadd.f32 %v133_v53, %v132_v52 }
  0xf3   :  { %v135_v55 = vrot.slane %v134_v54, 2 }
  0xf5   :  { %v136_v56 = vadd.f32 %v135_v55, %v134_v54 }
  0xf7   :  { %v137_v57 = vrot.slane %v136_v56, 1 }
  0xf9   :  { %v138_v58 = vadd.f32 %v137_v57, %v136_v56 }
  0xfb   :  { %v139_v59 = vmul.f32 0.125, %v138_v58 }
  0xfd   :  { %v140_v60 = vadd.f32 1e-05, %v139_v59 }
  0xff   :  { %1328 = vrsqrt.f32 %v140_v60 }
 0x109   :  { %v1329_v61 = vpop.eup %1328 }
 0x10a   :  { %v142_v62 = vmul.f32 %v1329_v61, %v131_v51 }
 0x10c   :  { %v148_v0 = vmul.f32 %v146_v63, %v142_v62 }
 0x10e   :  { %v1545_v2 = vadd.f32 %v152_v1, %v148_v0 }
 0x110   :  { %1285 = vmatpush3.msra.mxu0 %v1545_v2 }
 0x111   :  { %1287 = vmatmul.mubr.msk.f32.vlgmr.msra.gmra.mrb[2].mxu0 %vm338_vm2, %v1550_v3  ;;  %1289 = vmatprep.subr.mxu0 %v1398_v4 }
 0x112   :  { %1291 = vmatprep.mubr.msk.f32.mxu0 %vm1397_vm0, %v1398_v4 }
 0x1e4   :  { %v408_v11 = vpop.f32.mrb[2].mxu0 }
 0x1e5   :  { %v409_v15 = vadd.f32 %v408_v11, %v1560_v10  ;;  %v1288_v16 = vpop.f32.mrb[3].mxu0 }
 0x1e7   :  { %v412_v17 = vmul.f32 %v409_v15, %v1564_v13  ;;  %v413_v18 = vmul.f32 %v409_v15, %v1558_v9  ;;  %v414_v19 = vmul.f32 %v409_v15, %v1566_v14  ;;  %v415_v20 = vmul.f32 %v409_v15, %v1562_v12 }
 0x1e9   :  { %v416_v21 = vrot.slane %v412_v17, 4  ;;  %v422_v22 = vrot.slane %v413_v18, 4  ;;  %v428_v23 = vrot.slane %v414_v19, 4  ;;  %v434_v24 = vrot.slane %v415_v20, 4 }
 0x1eb   :  { %v417_v25 = vadd.f32 %v416_v21, %v412_v17  ;;  %v423_v26 = vadd.f32 %v422_v22, %v413_v18  ;;  %v429_v27 = vadd.f32 %v428_v23, %v414_v19  ;;  %v435_v28 = vadd.f32 %v434_v24, %v415_v20 }
 0x1ec   :  { %v478_v21 = vlaneseq }
 0x1ed   :  { %v418_v29 = vrot.slane %v417_v25, 2  ;;  %v424_v30 = vrot.slane %v423_v26, 2  ;;  %v430_v31 = vrot.slane %v429_v27, 2  ;;  %v436_v32 = vrot.slane %v435_v28, 2 }
 0x1ee   :  { %v479_v22 = vshrl.u32 %v478_v21, 7 }
 0x1ef   :  { %v419_v33 = vadd.f32 %v418_v29, %v417_v25  ;;  %v425_v34 = vadd.f32 %v424_v30, %v423_v26  ;;  %v431_v35 = vadd.f32 %v430_v31, %v429_v27  ;;  %v437_v36 = vadd.f32 %v436_v32, %v435_v28  ;;  %v186_v25 = vpop.permute.xlu0 %185  ;;  %v191_v27 = vpop.permute.xlu1 %190 }
 0x1f0   :  { %v1577_v23 = vsub.s32 0, %v479_v22  ;;  %v1581_v32 = vadd.f32 %v1537_v44, %v191_v27 }
 0x1f1   :  { %v420_v37 = vrot.slane %v419_v33, 1  ;;  %v426_v38 = vrot.slane %v425_v34, 1  ;;  %v432_v39 = vrot.slane %v431_v35, 1  ;;  %v438_v40 = vrot.slane %v437_v36, 1 }
 0x1f3   :  { %v421_v41 = vadd.f32 %v420_v37, %v419_v33  ;;  %v427_v42 = vadd.f32 %v426_v38, %v425_v34  ;;  %v433_v43 = vadd.f32 %v432_v39, %v431_v35  ;;  %v439_v46 = vadd.f32 %v438_v40, %v437_v36  ;;  %v196_v37 = vpop.permute.xlu0 %195 }
 0x1f4   :  { %v1584_v33 = vadd.f32 %v1539_v45, %v186_v25  ;;  %v1590_v38 = vadd.f32 %v1543_v49, %v196_v37 }
 0x1f5   :  { %v440_v47 = vmax.f32 %v421_v41, %v427_v42  ;;  %v441_v50 = vmax.f32 %v433_v43, %v439_v46 }
 0x1f7   :  { %v442_v51 = vmax.f32 %v440_v47, %v441_v50 }
 0x1f9   :  { %v443_v52 = vsub.f32 %v421_v41, %v442_v51  ;;  %v444_v53 = vsub.f32 %v427_v42, %v442_v51  ;;  %v445_v54 = vsub.f32 %v433_v43, %v442_v51  ;;  %v446_v55 = vsub.f32 %v439_v46, %v442_v51  ;;  %v201_v41 = vpop.permute.xlu1 %200 }
 0x1fa   :  { %v1596_v45 = vadd.f32 %v1541_v48, %v201_v41 }
 0x1fb   :  { %v447_v56 = vmul.f32 1.442695, %v443_v52  ;;  %v449_v57 = vmul.f32 1.442695, %v444_v53  ;;  %v451_v58 = vmul.f32 1.442695, %v445_v54 }
 0x1fc   :  { %v453_v59 = vmul.f32 1.442695, %v446_v55 }
 0x1fd   :  { %1330 = vpow2.f32 %v447_v56 }
 0x1fe   :  { %1332 = vpow2.f32 %v449_v57 }
 0x1ff   :  { %1334 = vpow2.f32 %v451_v58 }
 0x200   :  { %1336 = vpow2.f32 %v453_v59 }
 0x207   :  { %v1331_v60 = vpop.eup %1330 }
 0x208   :  { %v1333_v61 = vpop.eup %1332 }
 0x209   :  { %v1335_v62 = vpop.eup %1334  ;;  %v459_v63 = vrot.slane %v1333_v61, 7 }
 0x20a   :  { %v1337_v0 = vpop.eup %1336  ;;  %v462_v1 = vrot.slane %v1335_v62, 6 }
 0x20b   :  { %v461_v5 = vsel %vm460_vm3, %v459_v63, %v1331_v60  ;;  %v465_v6 = vrot.slane %v1337_v0, 5 }
 0x20c   :  { %v464_v7 = vsel %vm463_vm4, %v462_v1, %v461_v5 }
 0x20d   :  { %v467_v8 = vsel %vm466_vm5, %v465_v6, %v464_v7  ;;  %v1600_v7 = vpop.permute.xlu0 %530 }
 0x20e   :  { %v470_v11 = vsel %vm469_vm6, %v467_v8, 0.0 }
 0x20f   :  { %v471_v15 = vrot.slane %v470_v11, 4 }
 0x211   :  { %v472_v16 = vadd.f32 %v471_v15, %v470_v11  ;;  %v1603_v11 = vpop.permute.xlu1 %536 }
 0x213   :  { %v473_v17 = vrot.slane %v472_v16, 2 }
 0x215   :  { %v474_v18 = vadd.f32 %v473_v17, %v472_v16  ;;  %v1610_v17 = vld [vmem:[%s1710_s4] sm:$0xff]  ;;  %s1400_s4 = smov [#allocation2]  }
 0x216   :  { %s1213_s26 = sshll.u32 %s1400_s4, 4  ;;  %s1214_s26 = int_to_ptr.vmem [resolvable:$true] %s1213_s26 }
 0x217   :  { %v475_v19 = vrot.slane %v474_v18, 1  ;;  %s1372_s0 = scalar_lea.vmem %s1214_s26, 128  ;;  %p1377_p1 = scmp.lt.s32.totalorder %s1214_s26, %s1214_s26 }
 0x218   :  { %p1373_p0 = scmp.ne.s32.totalorder %s1214_s26, %s1372_s0  ;;  %p1378_p2 = scmp.lt.s32.totalorder %s1372_s0, %s1372_s0 }
 0x219   :  { %v476_v20 = vadd.f32 %v475_v19, %v474_v18  ;;  %v1617_v18 = vpop.permute.xlu0 %544 }
 0x21a   :  { %p1379_p3 = por %p1378_p2, %p1377_p1 }
 0x21b   :  { %1338 = vrcp.f32 %v476_v20 }
 0x21c   :  { %p1380_p4 = pnand %p1379_p3, %p1373_p0 }
 0x225   :  { %v1339_v24 = vpop.eup %1338 }
 0x226   :  { %v481_v26 = vrot.slane %v1339_v24, %v1577_v23 }
 0x228   :  { %v482_v28 = vmul.f32 %v1331_v60, %v481_v26  ;;  %v483_v29 = vmul.f32 %v1333_v61, %v481_v26  ;;  %v484_v30 = vmul.f32 %v1335_v62, %v481_v26  ;;  %v485_v31 = vmul.f32 %v1337_v0, %v481_v26 }
 0x22a   :  { %v489_v34 = vrot.slane %v482_v28, %v1577_v23  ;;  %v493_v35 = vrot.slane %v483_v29, %v1577_v23  ;;  %v497_v36 = vrot.slane %v484_v30, %v1577_v23  ;;  %v501_v39 = vrot.slane %v485_v31, %v1577_v23 }
 0x22c   :  { %v502_v40 = vmul.f32 %v489_v34, %v1584_v33  ;;  %v503_v44 = vmul.f32 %v493_v35, %v1581_v32  ;;  %v504_v42 = vmul.f32 %v497_v36, %v1590_v38  ;;  %v505_v46 = vmul.f32 %v501_v39, %v1596_v45 }
 0x22e   :  { %v506_v43 = vadd.f32 %v503_v44, %v502_v40 }
 0x230   :  { %v507_v47 = vadd.f32 %v506_v43, %v504_v42  ;;  %v1620_v43 = vpop.permute.xlu1 %641 }
 0x232   :  { %v508_v50 = vadd.f32 %v507_v47, %v505_v46  ;;  %v1623_v47 = vpop.permute.xlu0 %647 }
 0x234   :  { %v509_v51 = vrot.slane %v508_v50, 4 }
 0x236   :  { %v510_v49 = vadd.f32 %v509_v51, %v508_v50 }
 0x238   :  { %v511_v52 = vrot.slane %v510_v49, 2 }
 0x23a   :  { %v512_v53 = vadd.f32 %v511_v52, %v510_v49 }
 0x23c   :  { %v513_v54 = vrot.slane %v512_v53, 1 }
 0x23e   :  { %v514_v55 = vadd.f32 %v513_v54, %v512_v53 }
 0x240   :  { %v515_v56 = vmul.f32 0.125, %v514_v55 }
 0x242   :  { %v516_v57 = vsub.f32 %v508_v50, %v515_v56 }
 0x244   :  { %v517_v58 = vmul.f32 %v516_v57, %v516_v57 }
 0x246   :  { %v518_v59 = vrot.slane %v517_v58, 4 }
 0x248   :  { %v519_v60 = vadd.f32 %v518_v59, %v517_v58 }
 0x24a   :  { %v520_v48 = vrot.slane %v519_v60, 2 }
 0x24c   :  { %v521_v61 = vadd.f32 %v520_v48, %v519_v60 }
 0x24e   :  { %v522_v62 = vrot.slane %v521_v61, 1 }
 0x250   :  { %v523_v63 = vadd.f32 %v522_v62, %v521_v61 }
 0x252   :  { %v524_v0 = vmul.f32 0.125, %v523_v63 }
 0x254   :  { %v525_v1 = vadd.f32 1e-05, %v524_v0 }
 0x256   :  { %1340 = vrsqrt.f32 %v525_v1 }
 0x260   :  { %v1341_v5 = vpop.eup %1340 }
 0x261   :  { %v527_v6 = vmul.f32 %v1341_v5, %v516_v57 }
 0x263   :  { %v533_v8 = vmul.f32 %v1600_v7, %v527_v6 }
 0x265   :  { %v539_v15 = vadd.f32 %v1603_v11, %v533_v8 }
 0x267   :  { %v540_v16 = vadd.f32 %v539_v15, %v1545_v2 }
 0x269   :  { %1290 = vmatpush3.msra.mxu0 %v540_v16 }
 0x26a   :  { %1292 = vmatmul.mubr.msk.f32.vlgmr.msra.gmra.mrb[4].mxu0 %vm338_vm2, %v1610_v17  ;;  %1294 = vmatprep.subr.mxu0 %v1398_v4 }
 0x26b   :  { %1296 = vmatprep.mubr.msk.f32.mxu0 %vm1397_vm0, %v1398_v4 }
 0x33d   :  { %v616_v19 = vpop.f32.mrb[4].mxu0 }
 0x33e   :  { %v617_v20 = vadd.f32 %v616_v19, %v1617_v18  ;;  %v1293_v2 = vpop.f32.mrb[5].mxu0 }
 0x340   :  { %v620_v21 = vrot.slane %v617_v20, 4 }
 0x342   :  { %v621_v22 = vadd.f32 %v620_v21, %v617_v20 }
 0x344   :  { %v622_v24 = vrot.slane %v621_v22, 2 }
 0x346   :  { %v623_v25 = vadd.f32 %v622_v24, %v621_v22 }
 0x348   :  { %v624_v26 = vrot.slane %v623_v25, 1 }
 0x34a   :  { %v625_v27 = vadd.f32 %v624_v26, %v623_v25 }
 0x34c   :  { %v626_v28 = vmul.f32 0.125, %v625_v27 }
 0x34e   :  { %v627_v29 = vsub.f32 %v617_v20, %v626_v28 }
 0x350   :  { %v628_v30 = vmul.f32 %v627_v29, %v627_v29 }
 0x352   :  { %v629_v31 = vrot.slane %v628_v30, 4 }
 0x354   :  { %v630_v34 = vadd.f32 %v629_v31, %v628_v30 }
 0x356   :  { %v631_v35 = vrot.slane %v630_v34, 2 }
 0x358   :  { %v632_v36 = vadd.f32 %v631_v35, %v630_v34 }
 0x35a   :  { %v633_v37 = vrot.slane %v632_v36, 1 }
 0x35c   :  { %v634_v39 = vadd.f32 %v633_v37, %v632_v36 }
 0x35e   :  { %v635_v40 = vmul.f32 0.125, %v634_v39 }
 0x360   :  { %v636_v44 = vadd.f32 1e-05, %v635_v40 }
 0x362   :  { %1342 = vrsqrt.f32 %v636_v44 }
 0x36c   :  { %v1343_v41 = vpop.eup %1342 }
 0x36d   :  { %v638_v42 = vmul.f32 %v1343_v41, %v627_v29 }
 0x36f   :  { %v644_v46 = vmul.f32 %v1620_v43, %v638_v42 }
 0x371   :  { %v650_v50 = vadd.f32 %v1623_v47, %v644_v46 }
 0x373   :  { %v1626_v51 = vadd.f32 %v650_v50, %v540_v16 }
 0x375   :  { %1295 = vmatpush3.msra.mxu0 %v1626_v51 }
 0x376   :  { %1297 = vmatmul.mubr.msk.f32.vlgmr.msra.gmra.mrb[6].mxu0 %vm338_vm2, %v1550_v3  ;;  %1299 = vmatprep.subr.mxu0 %v1398_v4 }
 0x377   :  { %1301 = vmatprep.mubr.msk.f32.mxu0 %vm1397_vm0, %v1398_v4 }
 0x449   :  { %v718_v49 = vpop.f32.mrb[6].mxu0 }
 0x44a   :  { %v719_v52 = vadd.f32 %v718_v49, %v1560_v10  ;;  %v1298_v53 = vpop.f32.mrb[7].mxu0 }
 0x44c   :  { %v722_v54 = vmul.f32 %v719_v52, %v1564_v13  ;;  %v723_v55 = vmul.f32 %v719_v52, %v1558_v9  ;;  %v724_v56 = vmul.f32 %v719_v52, %v1566_v14  ;;  %v725_v57 = vmul.f32 %v719_v52, %v1562_v12 }
 0x44e   :  { %v726_v58 = vrot.slane %v722_v54, 4  ;;  %v732_v59 = vrot.slane %v723_v55, 4  ;;  %v738_v60 = vrot.slane %v724_v56, 4  ;;  %v744_v48 = vrot.slane %v725_v57, 4 }
 0x450   :  { %v727_v61 = vadd.f32 %v726_v58, %v722_v54  ;;  %v733_v62 = vadd.f32 %v732_v59, %v723_v55  ;;  %v739_v63 = vadd.f32 %v738_v60, %v724_v56  ;;  %v745_v0 = vadd.f32 %v744_v48, %v725_v57 }
 0x452   :  { %v728_v1 = vrot.slane %v727_v61, 2  ;;  %v734_v5 = vrot.slane %v733_v62, 2  ;;  %v740_v6 = vrot.slane %v739_v63, 2  ;;  %v746_v8 = vrot.slane %v745_v0, 2 }
 0x454   :  { %v729_v15 = vadd.f32 %v728_v1, %v727_v61  ;;  %v735_v16 = vadd.f32 %v734_v5, %v733_v62  ;;  %v741_v19 = vadd.f32 %v740_v6, %v739_v63  ;;  %v747_v20 = vadd.f32 %v746_v8, %v745_v0 }
 0x456   :  { %v730_v2 = vrot.slane %v729_v15, 1  ;;  %v736_v21 = vrot.slane %v735_v16, 1  ;;  %v742_v22 = vrot.slane %v741_v19, 1  ;;  %v748_v24 = vrot.slane %v747_v20, 1 }
 0x458   :  { %v731_v25 = vadd.f32 %v730_v2, %v729_v15  ;;  %v737_v26 = vadd.f32 %v736_v21, %v735_v16  ;;  %v743_v27 = vadd.f32 %v742_v22, %v741_v19  ;;  %v749_v28 = vadd.f32 %v748_v24, %v747_v20 }
 0x45a   :  { %v750_v29 = vmax.f32 %v731_v25, %v737_v26  ;;  %v751_v30 = vmax.f32 %v743_v27, %v749_v28 }
 0x45c   :  { %v752_v31 = vmax.f32 %v750_v29, %v751_v30 }
 0x45e   :  { %v753_v34 = vsub.f32 %v731_v25, %v752_v31  ;;  %v754_v35 = vsub.f32 %v737_v26, %v752_v31  ;;  %v755_v36 = vsub.f32 %v743_v27, %v752_v31  ;;  %v756_v37 = vsub.f32 %v749_v28, %v752_v31 }
 0x460   :  { %v757_v39 = vmul.f32 1.442695, %v753_v34  ;;  %v759_v40 = vmul.f32 1.442695, %v754_v35  ;;  %v761_v44 = vmul.f32 1.442695, %v755_v36 }
 0x461   :  { %v763_v41 = vmul.f32 1.442695, %v756_v37 }
 0x462   :  { %1344 = vpow2.f32 %v757_v39 }
 0x463   :  { %1346 = vpow2.f32 %v759_v40 }
 0x464   :  { %1348 = vpow2.f32 %v761_v44 }
 0x465   :  { %1350 = vpow2.f32 %v763_v41 }
 0x46c   :  { %v1345_v42 = vpop.eup %1344 }
 0x46d   :  { %v1347_v46 = vpop.eup %1346 }
 0x46e   :  { %v1349_v50 = vpop.eup %1348  ;;  %v769_v49 = vrot.slane %v1347_v46, 7 }
 0x46f   :  { %v1351_v52 = vpop.eup %1350  ;;  %v771_v53 = vrot.slane %v1349_v50, 6 }
 0x470   :  { %v770_v54 = vsel %vm460_vm3, %v769_v49, %v1345_v42  ;;  %v773_v55 = vrot.slane %v1351_v52, 5 }
 0x471   :  { %v772_v56 = vsel %vm463_vm4, %v771_v53, %v770_v54 }
 0x472   :  { %v774_v57 = vsel %vm466_vm5, %v773_v55, %v772_v56 }
 0x473   :  { %v776_v58 = vsel %vm469_vm6, %v774_v57, 0.0 }
 0x474   :  { %v777_v59 = vrot.slane %v776_v58, 4 }
 0x476   :  { %v778_v60 = vadd.f32 %v777_v59, %v776_v58 }
 0x478   :  { %v779_v48 = vrot.slane %v778_v60, 2 }
 0x47a   :  { %v780_v61 = vadd.f32 %v779_v48, %v778_v60 }
 0x47c   :  { %v781_v62 = vrot.slane %v780_v61, 1 }
 0x47e   :  { %v782_v63 = vadd.f32 %v781_v62, %v780_v61 }
 0x480   :  { %1352 = vrcp.f32 %v782_v63 }
 0x48a   :  { %v1353_v0 = vpop.eup %1352 }
 0x48b   :  { %v787_v1 = vrot.slane %v1353_v0, %v1577_v23 }
 0x48d   :  { %v788_v5 = vmul.f32 %v1345_v42, %v787_v1  ;;  %v789_v6 = vmul.f32 %v1347_v46, %v787_v1  ;;  %v790_v8 = vmul.f32 %v1349_v50, %v787_v1  ;;  %v791_v15 = vmul.f32 %v1351_v52, %v787_v1 }
 0x48f   :  { %v795_v16 = vrot.slane %v788_v5, %v1577_v23  ;;  %v799_v19 = vrot.slane %v789_v6, %v1577_v23  ;;  %v803_v20 = vrot.slane %v790_v8, %v1577_v23  ;;  %v807_v2 = vrot.slane %v791_v15, %v1577_v23 }
 0x491   :  { %v808_v21 = vmul.f32 %v795_v16, %v1584_v33  ;;  %v809_v22 = vmul.f32 %v799_v19, %v1581_v32  ;;  %v810_v24 = vmul.f32 %v803_v20, %v1590_v38  ;;  %v811_v26 = vmul.f32 %v807_v2, %v1596_v45 }
 0x493   :  { %v812_v25 = vadd.f32 %v809_v22, %v808_v21 }
 0x495   :  { %v813_v27 = vadd.f32 %v812_v25, %v810_v24 }
 0x497   :  { %v814_v28 = vadd.f32 %v813_v27, %v811_v26 }
 0x499   :  { %v815_v29 = vrot.slane %v814_v28, 4 }
 0x49b   :  { %v816_v30 = vadd.f32 %v815_v29, %v814_v28 }
 0x49d   :  { %v817_v31 = vrot.slane %v816_v30, 2 }
 0x49f   :  { %v818_v34 = vadd.f32 %v817_v31, %v816_v30 }
 0x4a1   :  { %v819_v35 = vrot.slane %v818_v34, 1 }
 0x4a3   :  { %v820_v36 = vadd.f32 %v819_v35, %v818_v34 }
 0x4a5   :  { %v821_v37 = vmul.f32 0.125, %v820_v36 }
 0x4a7   :  { %v822_v39 = vsub.f32 %v814_v28, %v821_v37 }
 0x4a9   :  { %v823_v40 = vmul.f32 %v822_v39, %v822_v39 }
 0x4ab   :  { %v824_v44 = vrot.slane %v823_v40, 4 }
 0x4ad   :  { %v825_v41 = vadd.f32 %v824_v44, %v823_v40 }
 0x4af   :  { %v826_v42 = vrot.slane %v825_v41, 2 }
 0x4b1   :  { %v827_v46 = vadd.f32 %v826_v42, %v825_v41 }
 0x4b3   :  { %v828_v50 = vrot.slane %v827_v46, 1 }
 0x4b5   :  { %v829_v49 = vadd.f32 %v828_v50, %v827_v46 }
 0x4b7   :  { %v830_v52 = vmul.f32 0.125, %v829_v49 }
 0x4b9   :  { %v831_v53 = vadd.f32 1e-05, %v830_v52 }
 0x4bb   :  { %1354 = vrsqrt.f32 %v831_v53 }
 0x4c5   :  { %v1355_v54 = vpop.eup %1354 }
 0x4c6   :  { %v833_v55 = vmul.f32 %v1355_v54, %v822_v39 }
 0x4c8   :  { %v834_v56 = vmul.f32 %v833_v55, %v1600_v7 }
 0x4ca   :  { %v835_v57 = vadd.f32 %v834_v56, %v1603_v11 }
 0x4cc   :  { %v836_v58 = vadd.f32 %v835_v57, %v1626_v51 }
 0x4ce   :  { %1300 = vmatpush3.msra.mxu0 %v836_v58 }
 0x4cf   :  { %1302 = vmatmul.mubr.msk.f32.vlgmr.msra.gmra.mrb[8].mxu0 %vm338_vm2, %v1610_v17  ;;  %1309 = vmatprep.subr.mxu0 %v1398_v4 }
 0x4d0   :  { %1311 = vmatprep.mubr.msk.f32.mxu0 %vm1397_vm0, %v1398_v4 }
 0x5a2   :  { %v903_v59 = vpop.f32.mrb[8].mxu0 }
 0x5a3   :  { %v904_v60 = vadd.f32 %v903_v59, %v1617_v18  ;;  %v1303_v48 = vpop.f32.mrb[9].mxu0 }
 0x5a5   :  { %v907_v61 = vrot.slane %v904_v60, 4 }
 0x5a7   :  { %v908_v62 = vadd.f32 %v907_v61, %v904_v60 }
 0x5a9   :  { %v909_v63 = vrot.slane %v908_v62, 2 }
 0x5ab   :  { %v910_v0 = vadd.f32 %v909_v63, %v908_v62 }
 0x5ad   :  { %v911_v1 = vrot.slane %v910_v0, 1 }
 0x5af   :  { %v912_v5 = vadd.f32 %v911_v1, %v910_v0 }
 0x5b1   :  { %v913_v51 = vmul.f32 0.125, %v912_v5 }
 0x5b3   :  { %v914_v6 = vsub.f32 %v904_v60, %v913_v51 }
 0x5b5   :  { %v915_v8 = vmul.f32 %v914_v6, %v914_v6 }
 0x5b7   :  { %v916_v15 = vrot.slane %v915_v8, 4 }
 0x5b9   :  { %v917_v16 = vadd.f32 %v916_v15, %v915_v8 }
 0x5bb   :  { %v918_v19 = vrot.slane %v917_v16, 2 }
 0x5bd   :  { %v919_v20 = vadd.f32 %v918_v19, %v917_v16 }
 0x5bf   :  { %v920_v2 = vrot.slane %v919_v20, 1 }
 0x5c1   :  { %v921_v21 = vadd.f32 %v920_v2, %v919_v20 }
 0x5c3   :  { %v922_v4 = vmul.f32 0.125, %v921_v21 }
 0x5c5   :  { %v923_v22 = vadd.f32 1e-05, %v922_v4 }
 0x5c7   :  { %1356 = vrsqrt.f32 %v923_v22 }
 0x5d1   :  { %v1357_v24 = vpop.eup %1356 }
 0x5d2   :  { %v925_v25 = vmul.f32 %v1357_v24, %v914_v6 }
 0x5d4   :  { %v926_v26 = vmul.f32 %v925_v25, %v1620_v43 }
 0x5d6   :  { %v927_v27 = vadd.f32 %v926_v26, %v1623_v47 }
 0x5d8   :  { %v1663_v28 = vadd.f32 %v927_v27, %v836_v58 }
 0x5da   :  { %1305 = vmatpush3.msra.mxu1 %v1663_v28 }
 0x5db   :  { %1307 = vmatmul.mubr.msk.f32.vlgmr.msra.gmra.mrb[8].mxu1 %vm338_vm2, %v1550_v3 }
 0x6ae   :  { %v995_v29 = vpop.f32.mrb[8].mxu1 }
 0x6af   :  { %v996_v30 = vadd.f32 %v995_v29, %v1560_v10  ;;  %v1308_v31 = vpop.f32.mrb[9].mxu1 }
 0x6b1   :  { %v999_v34 = vmul.f32 %v996_v30, %v1564_v13  ;;  %v1000_v35 = vmul.f32 %v996_v30, %v1558_v9  ;;  %v1001_v36 = vmul.f32 %v996_v30, %v1566_v14  ;;  %v1002_v37 = vmul.f32 %v996_v30, %v1562_v12 }
 0x6b3   :  { %v1003_v39 = vrot.slane %v999_v34, 4  ;;  %v1009_v40 = vrot.slane %v1000_v35, 4  ;;  %v1015_v44 = vrot.slane %v1001_v36, 4  ;;  %v1021_v41 = vrot.slane %v1002_v37, 4 }
 0x6b5   :  { %v1004_v42 = vadd.f32 %v1003_v39, %v999_v34  ;;  %v1010_v46 = vadd.f32 %v1009_v40, %v1000_v35  ;;  %v1016_v50 = vadd.f32 %v1015_v44, %v1001_v36  ;;  %v1022_v3 = vadd.f32 %v1021_v41, %v1002_v37 }
 0x6b7   :  { %v1005_v49 = vrot.slane %v1004_v42, 2  ;;  %v1011_v52 = vrot.slane %v1010_v46, 2  ;;  %v1017_v10 = vrot.slane %v1016_v50, 2  ;;  %v1023_v53 = vrot.slane %v1022_v3, 2 }
 0x6b9   :  { %v1006_v54 = vadd.f32 %v1005_v49, %v1004_v42  ;;  %v1012_v13 = vadd.f32 %v1011_v52, %v1010_v46  ;;  %v1018_v55 = vadd.f32 %v1017_v10, %v1016_v50  ;;  %v1024_v9 = vadd.f32 %v1023_v53, %v1022_v3 }
 0x6bb   :  { %v1007_v56 = vrot.slane %v1006_v54, 1  ;;  %v1013_v14 = vrot.slane %v1012_v13, 1  ;;  %v1019_v57 = vrot.slane %v1018_v55, 1  ;;  %v1025_v12 = vrot.slane %v1024_v9, 1 }
 0x6bd   :  { %v1008_v58 = vadd.f32 %v1007_v56, %v1006_v54  ;;  %v1014_v59 = vadd.f32 %v1013_v14, %v1012_v13  ;;  %v1020_v60 = vadd.f32 %v1019_v57, %v1018_v55  ;;  %v1026_v48 = vadd.f32 %v1025_v12, %v1024_v9 }
 0x6bf   :  { %v1027_v61 = vmax.f32 %v1008_v58, %v1014_v59  ;;  %v1028_v62 = vmax.f32 %v1020_v60, %v1026_v48 }
 0x6c1   :  { %v1029_v63 = vmax.f32 %v1027_v61, %v1028_v62 }
 0x6c3   :  { %v1030_v0 = vsub.f32 %v1008_v58, %v1029_v63  ;;  %v1031_v1 = vsub.f32 %v1014_v59, %v1029_v63  ;;  %v1032_v5 = vsub.f32 %v1020_v60, %v1029_v63  ;;  %v1033_v51 = vsub.f32 %v1026_v48, %v1029_v63 }
 0x6c5   :  { %v1034_v6 = vmul.f32 1.442695, %v1030_v0  ;;  %v1036_v8 = vmul.f32 1.442695, %v1031_v1  ;;  %v1038_v15 = vmul.f32 1.442695, %v1032_v5 }
 0x6c6   :  { %v1040_v16 = vmul.f32 1.442695, %v1033_v51 }
 0x6c7   :  { %1358 = vpow2.f32 %v1034_v6 }
 0x6c8   :  { %1360 = vpow2.f32 %v1036_v8 }
 0x6c9   :  { %1362 = vpow2.f32 %v1038_v15 }
 0x6ca   :  { %1364 = vpow2.f32 %v1040_v16 }
 0x6d1   :  { %v1359_v19 = vpop.eup %1358 }
 0x6d2   :  { %v1361_v20 = vpop.eup %1360 }
 0x6d3   :  { %v1363_v2 = vpop.eup %1362  ;;  %v1046_v21 = vrot.slane %v1361_v20, 7 }
 0x6d4   :  { %v1365_v4 = vpop.eup %1364  ;;  %v1048_v22 = vrot.slane %v1363_v2, 6 }
 0x6d5   :  { %v1047_v24 = vsel %vm460_vm3, %v1046_v21, %v1359_v19  ;;  %v1050_v25 = vrot.slane %v1365_v4, 5 }
 0x6d6   :  { %v1049_v26 = vsel %vm463_vm4, %v1048_v22, %v1047_v24 }
 0x6d7   :  { %v1051_v27 = vsel %vm466_vm5, %v1050_v25, %v1049_v26 }
 0x6d8   :  { %v1053_v29 = vsel %vm469_vm6, %v1051_v27, 0.0 }
 0x6d9   :  { %v1054_v30 = vrot.slane %v1053_v29, 4 }
 0x6db   :  { %v1055_v31 = vadd.f32 %v1054_v30, %v1053_v29 }
 0x6dd   :  { %v1056_v34 = vrot.slane %v1055_v31, 2 }
 0x6df   :  { %v1057_v35 = vadd.f32 %v1056_v34, %v1055_v31 }
 0x6e1   :  { %v1058_v36 = vrot.slane %v1057_v35, 1 }
 0x6e3   :  { %v1059_v37 = vadd.f32 %v1058_v36, %v1057_v35 }
 0x6e5   :  { %1366 = vrcp.f32 %v1059_v37 }
 0x6ef   :  { %v1367_v39 = vpop.eup %1366 }
 0x6f0   :  { %v1064_v40 = vrot.slane %v1367_v39, %v1577_v23 }
 0x6f2   :  { %v1065_v44 = vmul.f32 %v1359_v19, %v1064_v40  ;;  %v1066_v41 = vmul.f32 %v1361_v20, %v1064_v40  ;;  %v1067_v42 = vmul.f32 %v1363_v2, %v1064_v40  ;;  %v1068_v46 = vmul.f32 %v1365_v4, %v1064_v40 }
 0x6f4   :  { %v1072_v50 = vrot.slane %v1065_v44, %v1577_v23  ;;  %v1076_v3 = vrot.slane %v1066_v41, %v1577_v23  ;;  %v1080_v49 = vrot.slane %v1067_v42, %v1577_v23  ;;  %v1084_v52 = vrot.slane %v1068_v46, %v1577_v23 }
 0x6f6   :  { %v1085_v10 = vmul.f32 %v1072_v50, %v1584_v33  ;;  %v1086_v53 = vmul.f32 %v1076_v3, %v1581_v32  ;;  %v1087_v54 = vmul.f32 %v1080_v49, %v1590_v38  ;;  %v1088_v55 = vmul.f32 %v1084_v52, %v1596_v45 }
 0x6f8   :  { %v1089_v13 = vadd.f32 %v1086_v53, %v1085_v10 }
 0x6fa   :  { %v1090_v9 = vadd.f32 %v1089_v13, %v1087_v54 }
 0x6fc   :  { %v1091_v56 = vadd.f32 %v1090_v9, %v1088_v55 }
 0x6fe   :  { %v1092_v14 = vrot.slane %v1091_v56, 4 }
 0x700   :  { %v1093_v57 = vadd.f32 %v1092_v14, %v1091_v56 }
 0x702   :  { %v1094_v12 = vrot.slane %v1093_v57, 2 }
 0x704   :  { %v1095_v58 = vadd.f32 %v1094_v12, %v1093_v57 }
 0x706   :  { %v1096_v59 = vrot.slane %v1095_v58, 1 }
 0x708   :  { %v1097_v60 = vadd.f32 %v1096_v59, %v1095_v58 }
 0x70a   :  { %v1098_v48 = vmul.f32 0.125, %v1097_v60 }
 0x70c   :  { %v1099_v61 = vsub.f32 %v1091_v56, %v1098_v48 }
 0x70e   :  { %v1100_v23 = vmul.f32 %v1099_v61, %v1099_v61 }
 0x710   :  { %v1101_v62 = vrot.slane %v1100_v23, 4 }
 0x712   :  { %v1102_v33 = vadd.f32 %v1101_v62, %v1100_v23 }
 0x714   :  { %v1103_v63 = vrot.slane %v1102_v33, 2 }
 0x716   :  { %v1104_v32 = vadd.f32 %v1103_v63, %v1102_v33 }
 0x718   :  { %v1105_v0 = vrot.slane %v1104_v32, 1 }
 0x71a   :  { %v1106_v38 = vadd.f32 %v1105_v0, %v1104_v32 }
 0x71c   :  { %v1107_v1 = vmul.f32 0.125, %v1106_v38 }
 0x71e   :  { %v1108_v5 = vadd.f32 1e-05, %v1107_v1 }
 0x720   :  { %1368 = vrsqrt.f32 %v1108_v5 }
 0x72a   :  { %v1369_v45 = vpop.eup %1368 }
 0x72b   :  { %v1110_v51 = vmul.f32 %v1369_v45, %v1099_v61 }
 0x72d   :  { %v1111_v6 = vmul.f32 %v1110_v51, %v1600_v7 }
 0x72f   :  { %v1112_v8 = vadd.f32 %v1111_v6, %v1603_v11 }
 0x731   :  { %v1113_v15 = vadd.f32 %v1112_v8, %v1663_v28 }
 0x733   :  { %1310 = vmatpush3.msra.mxu0 %v1113_v15 }
 0x734   :  { %1312 = vmatmul.mubr.msk.f32.vlgmr.msra.gmra.mrb[10].mxu0 %vm338_vm2, %v1610_v17 }
 0x807   :  { %v1180_v16 = vpop.f32.mrb[10].mxu0 }
 0x808   :  { %v1181_v19 = vadd.f32 %v1180_v16, %v1617_v18  ;;  %v1313_v20 = vpop.f32.mrb[11].mxu0 }
 0x80a   :  { %v1184_v2 = vrot.slane %v1181_v19, 4 }
 0x80c   :  { %v1185_v21 = vadd.f32 %v1184_v2, %v1181_v19 }
 0x80e   :  { %v1186_v4 = vrot.slane %v1185_v21, 2 }
 0x810   :  { %v1187_v22 = vadd.f32 %v1186_v4, %v1185_v21 }
 0x812   :  { %v1188_v24 = vrot.slane %v1187_v22, 1 }
 0x814   :  { %v1189_v25 = vadd.f32 %v1188_v24, %v1187_v22 }
 0x816   :  { %v1190_v26 = vmul.f32 0.125, %v1189_v25 }
 0x818   :  { %v1191_v7 = vsub.f32 %v1181_v19, %v1190_v26 }
 0x81a   :  { %v1192_v27 = vmul.f32 %v1191_v7, %v1191_v7 }
 0x81c   :  { %v1193_v11 = vrot.slane %v1192_v27, 4 }
 0x81e   :  { %v1194_v29 = vadd.f32 %v1193_v11, %v1192_v27 }
 0x820   :  { %v1195_v28 = vrot.slane %v1194_v29, 2 }
 0x822   :  { %v1196_v30 = vadd.f32 %v1195_v28, %v1194_v29 }
 0x824   :  { %v1197_v31 = vrot.slane %v1196_v30, 1 }
 0x826   :  { %v1198_v34 = vadd.f32 %v1197_v31, %v1196_v30 }
 0x828   :  { %v1199_v17 = vmul.f32 0.125, %v1198_v34 }
 0x82a   :  { %v1200_v35 = vadd.f32 1e-05, %v1199_v17 }
 0x82c   :  { %1370 = vrsqrt.f32 %v1200_v35 }
 0x836   :  { %v1371_v18 = vpop.eup %1370 }
 0x837   :  { %v1202_v36 = vmul.f32 %v1371_v18, %v1191_v7 }
 0x839   :  { %v1203_v37 = vmul.f32 %v1202_v36, %v1620_v43 }
 0x83b   :  { %v1204_v39 = vadd.f32 %v1203_v37, %v1623_v47 }
 0x83d   :  { %v1205_v40 = vadd.f32 %v1204_v39, %v1113_v15 }
 0x83f   :  { %1206 = vst [vmem:[#allocation2] sm:$0xff] %v1205_v40 }
 0x840   :  { %1383 = shalt.err (!%p1380_p4)
}
 0x841   :  { %s1384_s29 = scalar_lea.hbm %s1712_s6, 128 }
 0x842   :  { %p1385_p5 = scmp.ne.s32.totalorder %s1712_s6, %s1384_s29  ;;  %p1388_p6 = scmp.lt.u32.totalorder %s1384_s29, %s1712_s6 }
 0x844   :  { %p1390_p7 = pnand %p1388_p6, %p1385_p5 }
 0x846   :  { %1393 = shalt.err (!%p1390_p7)
}
 0x847   :  { %1216 = dma.vmem_to_hbm [thread:$0]  %s1214_s26, 128, %s1712_s6, [#allocation3]  }
 0x848   :  { %1394 = dma.done.wait [#allocation3], 128  }
 0x849   :  { %1395 = vsyncadd [#allocation3], 4294967168 }
 0x84a   :  { %1220 = vsyncpa [#allocation3], 1 }

</bundles_post_ra>
